<compile_context>
chip_gen: v7x
topology: tpu7x:2x2x1
jax: 0.10.0
libtpu: 0.0.40
codegen_flags: <defaults>
</compile_context>

<pallas_src>
import functools

import jax
import jax.numpy as jnp
from jax.experimental import pallas as pl
from jax.experimental.pallas import tpu as pltpu  # noqa: F401  (TPU backend)


# ----------------------------------------------------------------------------
# Fused Pallas kernel: the whole forward pass in a single invocation
# ----------------------------------------------------------------------------
def _fused_gat_kernel(*refs, num_gat, num_heads, skip_coefs, neg_slope=0.2):
    # refs layout (inputs..., output):
    #   x, mask_bias, head_mask,
    #   lin_in_w, lin_in_b,
    #   [W, att_packed, bn_scale, bn_shift] * num_gat,
    #   lin_out_w, lin_out_b, o_ref
    it = iter(refs)
    x_ref = next(it)
    mask_ref = next(it)
    hmask_ref = next(it)
    win_ref = next(it)
    bin_ref = next(it)
    layers = [tuple(next(it) for _ in range(4)) for _ in range(num_gat)]
    wout_ref = next(it)
    bout_ref = next(it)
    o_ref = next(it)

    f32 = jnp.float32
    H = num_heads
    mask_bias = mask_ref[...]       # [N, N]; 0 on edges, -1e30 off
    head_mask = hmask_ref[...]      # [H, HC]; 1 in head-h lanes, 0 elsewhere

    # convs[0]: input Linear
    x = jnp.dot(x_ref[...], win_ref[...], preferred_element_type=f32) + bin_ref[...]
    x_skip = x
    acc = None                      # running sum(outs)

    for l in range(num_gat):
        w_ref, att_ref, scale_ref, shift_ref = layers[l]

        # one full-width projection per layer (single MXU op)
        xp = jnp.dot(x, w_ref[...], preferred_element_type=f32)            # [N, HC]
        # all attention logits for all heads in one matmul:
        #   columns [0:H]  -> alpha_dst per head, columns [H:2H] -> alpha_src
        alpha = jnp.dot(xp, att_ref[...], preferred_element_type=f32)      # [N, 2H]
        # single XLU transpose of the src block (instead of H transposes)
        alpha_src_t = jnp.transpose(alpha[:, H:2 * H])                     # [H, N]

        out_full = None
        for h in range(H):                                                 # H is tiny, unrolled
            # e[dst, src] = alpha_dst[dst] + alpha_src[src]
            e = alpha[:, h:h + 1] + alpha_src_t[h:h + 1, :]                # [N, N]
            e = jnp.where(e > 0, e, f32(neg_slope) * e)                    # LeakyReLU
            e = e + mask_bias                                              # additive edge mask
            m = jnp.max(e, axis=-1, keepdims=True)
            p = jnp.exp(e - m)                     # exact 0 for non-edges (underflow)
            denom = jnp.sum(p, axis=-1, keepdims=True)                     # [N, 1]

            # aggregation BEFORE normalization: p @ xp_h doesn't wait on denom
            xp_h = xp * head_mask[h:h + 1, :]                              # VPU lane mask
            contrib = jnp.dot(p, xp_h, preferred_element_type=f32)         # [N, HC]

            # EUP approx reciprocal + one Newton step (keeps ~f32 accuracy)
            inv = pl.reciprocal(denom, approx=True)
            inv = inv * (f32(2.0) - denom * inv)
            contrib = contrib * inv                                        # row-scale on VPU

            out_full = contrib if out_full is None else out_full + contrib

        # fused (GAT post-concat bias + eval BatchNorm) as scale/shift, skip, ReLU
        y = out_full * scale_ref[...] + shift_ref[...]
        if skip_coefs[l] != 0.0:
            y = y + f32(skip_coefs[l]) * x_skip
        x = jnp.maximum(y, f32(0.0))
        acc = x if acc is None else acc + x        # dropout: identity in eval mode

    # convs[-1]: output Linear on sum(outs)
    # TODO(synk): if this kernel is ever batched / gridded, pad the 6-lane
    # output to a multiple of 128 lanes and slice host-side (lane-dense vst).
    o_ref[...] = (
        jnp.dot(acc, wout_ref[...], preferred_element_type=f32) + bout_ref[...]
    )


def gat_forward(x, kernel_inputs, *, num_gat, in_head, out_channels,
                skip_coefficient):
    """Single fused pallas_call for the whole forward pass."""
    N = x.shape[0]
    skip_coefs = tuple(
        float(skip_coefficient) if ((l + 1) % 2 == 0) else 0.0
        for l in range(num_gat))
    kernel = functools.partial(
        _fused_gat_kernel, num_gat=num_gat, num_heads=in_head,
        skip_coefs=skip_coefs)
    # No grid: whole-array VMEM blocks for every operand (everything is tiny).
    return pl.pallas_call(
        kernel,
        out_shape=jax.ShapeDtypeStruct((N, out_channels), jnp.float32),
    )(x, *kernel_inputs)


# ----------------------------------------------------------------------------
# Host-side parameter preparation (done once, outside the hot path)
# ----------------------------------------------------------------------------
def prepare_kernel_inputs(params, adj, hidden_channels, in_head):
    """Fold / pack raw parameters into the operands the fused kernel consumes.

    Precondition: every row of `adj` must have at least one nonzero entry
    (self-loops guarantee this); otherwise the additive -1e30 mask would
    produce 0/0 in the softmax.
    """
    H, F = in_head, hidden_channels
    HC = H * F
    # additive edge mask: 0 on edges, -1e30 elsewhere (self-loops already in adj)
    mask_bias = (adj - 1.0) * jnp.float32(1e30)

    # per-head 0/1 lane masks, shared by all layers
    head_mask = jnp.zeros((H, HC), jnp.float32)
    for h in range(H):
        head_mask = head_mask.at[h, h * F:(h + 1) * F].set(1.0)

    inputs = [mask_bias, head_mask, params["lin_in_w"], params["lin_in_b"]]
    for layer, bn in zip(params["gat_layers"], params["bns"]):
        W = layer["w"]                                  # [HC, HC] — passed as-is
        # pack all per-head att vectors into one [HC, 2H] matrix:
        #   column h      : att_dst for head h (nonzero only in head-h rows)
        #   column H + h  : att_src for head h
        A = jnp.zeros((HC, 2 * H), jnp.float32)
        for h in range(H):
            sl = slice(h * F, (h + 1) * F)
            A = A.at[sl, h].set(layer["att_dst"][h, 0])
            A = A.at[sl, H + h].set(layer["att_src"][h, 0])
        scale = bn["gamma"] / jnp.sqrt(bn["var"] + 1e-5)
        # fold GAT post-concat bias into the BN shift: scale*(v+b)+s = scale*v + (s+scale*b)
        shift = bn["beta"] - bn["mean"] * scale + layer["bias"][0] * scale
        inputs += [W, A, scale[None, :], shift[None, :]]
    inputs += [params["lin_out_w"], params["lin_out_b"]]
    return inputs


def init_params(key, in_channels, hidden_channels, out_channels,
                num_layers, in_head):
    hc = hidden_channels * in_head
    num_gat = num_layers - 2
    keys = jax.random.split(key, 4 + 8 * num_gat + 1)
    k = iter(keys)

    def nrm(shape, scale=0.1):
        return scale * jax.random.normal(next(k), shape, jnp.float32)

    params = {
        "lin_in_w": nrm((in_channels, hc)),
        "lin_in_b": nrm((1, hc)),
        "lin_out_w": nrm((hc, out_channels)),
        "lin_out_b": nrm((1, out_channels)),
        "gat_layers": [],
        "bns": [],
    }
    for _ in range(num_gat):
        params["gat_layers"].append({
            "w": nrm((hc, in_head * hidden_channels)),       # GATConv lin (no bias)
            "att_src": nrm((in_head, 1, hidden_channels)),
            "att_dst": nrm((in_head, 1, hidden_channels)),
            "bias": nrm((1, in_head * hidden_channels)),     # post-concat bias
        })
        params["bns"].append({
            "gamma": 1.0 + nrm((hc,)),
            "beta": nrm((hc,)),
            "mean": nrm((hc,)),
            "var": 1.0 + jnp.abs(nrm((hc,))),
        })
    return params


# ----------------------------------------------------------------------------
# Pure-JAX reference (mirrors PyG GATConv + eval BN semantics) for validation
# ----------------------------------------------------------------------------
def reference_forward(x, adj, params, skip_coefficient, hidden_channels, in_head):
    H, F = in_head, hidden_channels
    N = x.shape[0]
    x = x @ params["lin_in_w"] + params["lin_in_b"]
    x_skip = x
    outs = []
    for i, (layer, bn) in enumerate(
            zip(params["gat_layers"], params["bns"]), start=1):
        xp = x @ layer["w"]                                   # [N, H*F]
        xph = xp.reshape(N, H, F)
        a_src = layer["att_src"][:, 0, :]                     # [H, F]
        a_dst = layer["att_dst"][:, 0, :]
        alpha_src = jnp.einsum("nhf,hf->nh", xph, a_src)
        alpha_dst = jnp.einsum("nhf,hf->nh", xph, a_dst)
        e = alpha_dst[:, None, :] + alpha_src[None, :, :]     # [dst, src, H]
        e = jnp.where(e > 0, e, 0.2 * e)
        e = jnp.where(adj[:, :, None] > 0, e, jnp.float32(-1e30))
        attn = jax.nn.softmax(e, axis=1)                      # over src
        out = jnp.einsum("ijh,jhf->ihf", attn, xph).reshape(N, H * F)
        out = out + layer["bias"]
        scale = bn["gamma"] / jnp.sqrt(bn["var"] + 1e-5)
        shift = bn["beta"] - bn["mean"] * scale
        y = out * scale + shift
        if i % 2 == 0:
            y = y + skip_coefficient * x_skip
        x = jnp.maximum(y, 0.0)
        outs.append(x)
    x = sum(outs)
    return x @ params["lin_out_w"] + params["lin_out_b"]


# ----------------------------------------------------------------------------
# Main
# ----------------------------------------------------------------------------
if __name__ == "__main__":
    # module hyper-params
    in_channels = 8
    hidden_channels = 16
    out_channels = 6
    dropout = 0.5          # eval mode -> identity
    num_layers = 4         # -> 2 GATConv layers (i=1, i=2; skip applied at i=2)
    skip_coefficient = 0.5
    in_head = 2
    out_head = 1           # unused by the forward pass

    N, E = 16, 40          # small graph

    key = jax.random.PRNGKey(0)
    kx, ksrc, kdst, kparams = jax.random.split(key, 4)

    x = jax.random.normal(kx, (N, in_channels), jnp.float32)
    src = jax.random.randint(ksrc, (E,), 0, N)
    dst = jax.random.randint(kdst, (E,), 0, N)
    edge_index = jnp.stack([src, dst])                         # [2, E]

    # dense adjacency mask adj[dst, src] (+ self loops, GATConv default)
    adj = jnp.zeros((N, N), jnp.float32)
    adj = adj.at[edge_index[1], edge_index[0]].set(1.0)
    adj = adj.at[jnp.arange(N), jnp.arange(N)].set(1.0)
    # precondition for the additive -1e30 mask: every dst row has an edge
    assert bool(jnp.all(jnp.sum(adj, axis=1) >= 1.0))

    params = init_params(kparams, in_channels, hidden_channels, out_channels,
                         num_layers, in_head)
    num_gat = num_layers - 2
    kernel_inputs = prepare_kernel_inputs(params, adj, hidden_channels, in_head)

    out = gat_forward(x, kernel_inputs, num_gat=num_gat, in_head=in_head,
                      out_channels=out_channels,
                      skip_coefficient=skip_coefficient)
    out = jax.block_until_ready(out)

    ref = reference_forward(x, adj, params, skip_coefficient,
                            hidden_channels, in_head)

    assert out.shape == (N, out_channels), out.shape
    assert jnp.all(jnp.isfinite(out))
    assert jnp.allclose(out, ref, rtol=1e-3, atol=1e-3), (
        float(jnp.max(jnp.abs(out - ref))))
    print("KERNEL_OK")
</pallas_src>

<mosaic_0001>
module attributes {stable_mosaic.version = 11 : i64} {
  func.func @_fused_gat_kernel(%arg0: memref<16x8xf32, #tpu.memory_space<vmem>>, %arg1: memref<16x16xf32, #tpu.memory_space<vmem>>, %arg2: memref<2x32xf32, #tpu.memory_space<vmem>>, %arg3: memref<8x32xf32, #tpu.memory_space<vmem>>, %arg4: memref<1x32xf32, #tpu.memory_space<vmem>>, %arg5: memref<32x32xf32, #tpu.memory_space<vmem>>, %arg6: memref<32x4xf32, #tpu.memory_space<vmem>>, %arg7: memref<1x32xf32, #tpu.memory_space<vmem>>, %arg8: memref<1x32xf32, #tpu.memory_space<vmem>>, %arg9: memref<32x32xf32, #tpu.memory_space<vmem>>, %arg10: memref<32x4xf32, #tpu.memory_space<vmem>>, %arg11: memref<1x32xf32, #tpu.memory_space<vmem>>, %arg12: memref<1x32xf32, #tpu.memory_space<vmem>>, %arg13: memref<32x6xf32, #tpu.memory_space<vmem>>, %arg14: memref<1x6xf32, #tpu.memory_space<vmem>>, %arg15: memref<16x6xf32, #tpu.memory_space<vmem>>) attributes {dimension_semantics = [], scalar_prefetch = 0 : i64, scratch_operands = 0 : i64, tpu.core_type = #tpu.core_type<tc>} {
    %c0 = arith.constant 0 : index
    %c0_0 = arith.constant 0 : index
    %0 = vector.load %arg1[%c0, %c0_0] : memref<16x16xf32, #tpu.memory_space<vmem>>, vector<16x16xf32>
    %c0_1 = arith.constant 0 : index
    %c0_2 = arith.constant 0 : index
    %1 = vector.load %arg2[%c0_1, %c0_2] : memref<2x32xf32, #tpu.memory_space<vmem>>, vector<2x32xf32>
    %c0_3 = arith.constant 0 : index
    %c0_4 = arith.constant 0 : index
    %2 = vector.load %arg0[%c0_3, %c0_4] : memref<16x8xf32, #tpu.memory_space<vmem>>, vector<16x8xf32>
    %c0_5 = arith.constant 0 : index
    %c0_6 = arith.constant 0 : index
    %3 = vector.load %arg3[%c0_5, %c0_6] : memref<8x32xf32, #tpu.memory_space<vmem>>, vector<8x32xf32>
    %cst = arith.constant dense<0.000000e+00> : vector<16x32xf32>
    %4 = tpu.matmul %2, %3, %cst {dimension_numbers = #tpu.dot_dimension_numbers<[1], [0], [0], [1], [0, 0, 1, 1], [], []>} : vector<16x8xf32>, vector<8x32xf32>, vector<16x32xf32> -> vector<16x32xf32>
    %c0_7 = arith.constant 0 : index
    %c0_8 = arith.constant 0 : index
    %5 = vector.load %arg4[%c0_7, %c0_8] : memref<1x32xf32, #tpu.memory_space<vmem>>, vector<1x32xf32>
    %6 = vector.broadcast %5 : vector<1x32xf32> to vector<16x32xf32>
    %7 = arith.addf %4, %6 : vector<16x32xf32>
    %c0_9 = arith.constant 0 : index
    %c0_10 = arith.constant 0 : index
    %8 = vector.load %arg5[%c0_9, %c0_10] : memref<32x32xf32, #tpu.memory_space<vmem>>, vector<32x32xf32>
    %cst_11 = arith.constant dense<0.000000e+00> : vector<16x32xf32>
    %9 = tpu.matmul %7, %8, %cst_11 {dimension_numbers = #tpu.dot_dimension_numbers<[1], [0], [0], [1], [0, 0, 1, 1], [], []>} : vector<16x32xf32>, vector<32x32xf32>, vector<16x32xf32> -> vector<16x32xf32>
    %c0_12 = arith.constant 0 : index
    %c0_13 = arith.constant 0 : index
    %10 = vector.load %arg6[%c0_12, %c0_13] : memref<32x4xf32, #tpu.memory_space<vmem>>, vector<32x4xf32>
    %cst_14 = arith.constant dense<0.000000e+00> : vector<16x4xf32>
    %11 = tpu.matmul %9, %10, %cst_14 {dimension_numbers = #tpu.dot_dimension_numbers<[1], [0], [0], [1], [0, 0, 1, 1], [], []>} : vector<16x32xf32>, vector<32x4xf32>, vector<16x4xf32> -> vector<16x4xf32>
    %12 = vector.extract_strided_slice %11 {offsets = [0, 2], sizes = [16, 2], strides = [1, 1]} : vector<16x4xf32> to vector<16x2xf32>
    %13 = tpu.transpose %12, [1, 0] : vector<16x2xf32> -> vector<2x16xf32>
    %14 = vector.extract_strided_slice %11 {offsets = [0, 0], sizes = [16, 1], strides = [1, 1]} : vector<16x4xf32> to vector<16x1xf32>
    %15 = vector.extract_strided_slice %13 {offsets = [0, 0], sizes = [1, 16], strides = [1, 1]} : vector<2x16xf32> to vector<1x16xf32>
    %16 = vector.broadcast %14 : vector<16x1xf32> to vector<16x16xf32>
    %17 = vector.broadcast %15 : vector<1x16xf32> to vector<16x16xf32>
    %18 = arith.addf %16, %17 : vector<16x16xf32>
    %cst_15 = arith.constant 0.000000e+00 : f32
    %19 = vector.broadcast %cst_15 : f32 to vector<16x16xf32>
    %20 = arith.cmpf ogt, %18, %19 : vector<16x16xf32>
    %cst_16 = arith.constant 2.000000e-01 : f32
    %21 = vector.broadcast %cst_16 : f32 to vector<16x16xf32>
    %22 = arith.mulf %21, %18 : vector<16x16xf32>
    %23 = arith.select %20, %18, %22 : vector<16x16xi1>, vector<16x16xf32>
    %24 = arith.addf %23, %0 : vector<16x16xf32>
    %cst_17 = arith.constant dense<0xFF800000> : vector<16xf32>
    %25 = vector.multi_reduction <maximumf>, %24, %cst_17 [1] : vector<16x16xf32> to vector<16xf32>
    %26 = vector.shape_cast %25 : vector<16xf32> to vector<16x1xf32>
    %27 = vector.broadcast %26 : vector<16x1xf32> to vector<16x16xf32>
    %28 = arith.subf %24, %27 : vector<16x16xf32>
    %29 = math.exp %28 : vector<16x16xf32>
    %cst_18 = arith.constant dense<0.000000e+00> : vector<16xf32>
    %30 = vector.multi_reduction <add>, %29, %cst_18 [1] : vector<16x16xf32> to vector<16xf32>
    %31 = vector.shape_cast %30 : vector<16xf32> to vector<16x1xf32>
    %32 = vector.extract_strided_slice %1 {offsets = [0, 0], sizes = [1, 32], strides = [1, 1]} : vector<2x32xf32> to vector<1x32xf32>
    %33 = vector.broadcast %32 : vector<1x32xf32> to vector<16x32xf32>
    %34 = arith.mulf %9, %33 : vector<16x32xf32>
    %cst_19 = arith.constant dense<0.000000e+00> : vector<16x32xf32>
    %35 = tpu.matmul %29, %34, %cst_19 {dimension_numbers = #tpu.dot_dimension_numbers<[1], [0], [0], [1], [0, 0, 1, 1], [], []>} : vector<16x16xf32>, vector<16x32xf32>, vector<16x32xf32> -> vector<16x32xf32>
    %36 = tpu.reciprocal %31 {approx = true} : vector<16x1xf32> -> vector<16x1xf32>
    %37 = arith.mulf %31, %36 : vector<16x1xf32>
    %cst_20 = arith.constant 2.000000e+00 : f32
    %38 = vector.broadcast %cst_20 : f32 to vector<16x1xf32>
    %39 = arith.subf %38, %37 : vector<16x1xf32>
    %40 = arith.mulf %36, %39 : vector<16x1xf32>
    %41 = vector.broadcast %40 : vector<16x1xf32> to vector<16x32xf32>
    %42 = arith.mulf %35, %41 : vector<16x32xf32>
    %43 = vector.extract_strided_slice %11 {offsets = [0, 1], sizes = [16, 1], strides = [1, 1]} : vector<16x4xf32> to vector<16x1xf32>
    %44 = vector.extract_strided_slice %13 {offsets = [1, 0], sizes = [1, 16], strides = [1, 1]} : vector<2x16xf32> to vector<1x16xf32>
    %45 = vector.broadcast %43 : vector<16x1xf32> to vector<16x16xf32>
    %46 = vector.broadcast %44 : vector<1x16xf32> to vector<16x16xf32>
    %47 = arith.addf %45, %46 : vector<16x16xf32>
    %cst_21 = arith.constant 0.000000e+00 : f32
    %48 = vector.broadcast %cst_21 : f32 to vector<16x16xf32>
    %49 = arith.cmpf ogt, %47, %48 : vector<16x16xf32>
    %cst_22 = arith.constant 2.000000e-01 : f32
    %50 = vector.broadcast %cst_22 : f32 to vector<16x16xf32>
    %51 = arith.mulf %50, %47 : vector<16x16xf32>
    %52 = arith.select %49, %47, %51 : vector<16x16xi1>, vector<16x16xf32>
    %53 = arith.addf %52, %0 : vector<16x16xf32>
    %cst_23 = arith.constant dense<0xFF800000> : vector<16xf32>
    %54 = vector.multi_reduction <maximumf>, %53, %cst_23 [1] : vector<16x16xf32> to vector<16xf32>
    %55 = vector.shape_cast %54 : vector<16xf32> to vector<16x1xf32>
    %56 = vector.broadcast %55 : vector<16x1xf32> to vector<16x16xf32>
    %57 = arith.subf %53, %56 : vector<16x16xf32>
    %58 = math.exp %57 : vector<16x16xf32>
    %cst_24 = arith.constant dense<0.000000e+00> : vector<16xf32>
    %59 = vector.multi_reduction <add>, %58, %cst_24 [1] : vector<16x16xf32> to vector<16xf32>
    %60 = vector.shape_cast %59 : vector<16xf32> to vector<16x1xf32>
    %61 = vector.extract_strided_slice %1 {offsets = [1, 0], sizes = [1, 32], strides = [1, 1]} : vector<2x32xf32> to vector<1x32xf32>
    %62 = vector.broadcast %61 : vector<1x32xf32> to vector<16x32xf32>
    %63 = arith.mulf %9, %62 : vector<16x32xf32>
    %cst_25 = arith.constant dense<0.000000e+00> : vector<16x32xf32>
    %64 = tpu.matmul %58, %63, %cst_25 {dimension_numbers = #tpu.dot_dimension_numbers<[1], [0], [0], [1], [0, 0, 1, 1], [], []>} : vector<16x16xf32>, vector<16x32xf32>, vector<16x32xf32> -> vector<16x32xf32>
    %65 = tpu.reciprocal %60 {approx = true} : vector<16x1xf32> -> vector<16x1xf32>
    %66 = arith.mulf %60, %65 : vector<16x1xf32>
    %cst_26 = arith.constant 2.000000e+00 : f32
    %67 = vector.broadcast %cst_26 : f32 to vector<16x1xf32>
    %68 = arith.subf %67, %66 : vector<16x1xf32>
    %69 = arith.mulf %65, %68 : vector<16x1xf32>
    %70 = vector.broadcast %69 : vector<16x1xf32> to vector<16x32xf32>
    %71 = arith.mulf %64, %70 : vector<16x32xf32>
    %72 = arith.addf %42, %71 : vector<16x32xf32>
    %c0_27 = arith.constant 0 : index
    %c0_28 = arith.constant 0 : index
    %73 = vector.load %arg7[%c0_27, %c0_28] : memref<1x32xf32, #tpu.memory_space<vmem>>, vector<1x32xf32>
    %74 = vector.broadcast %73 : vector<1x32xf32> to vector<16x32xf32>
    %75 = arith.mulf %72, %74 : vector<16x32xf32>
    %c0_29 = arith.constant 0 : index
    %c0_30 = arith.constant 0 : index
    %76 = vector.load %arg8[%c0_29, %c0_30] : memref<1x32xf32, #tpu.memory_space<vmem>>, vector<1x32xf32>
    %77 = vector.broadcast %76 : vector<1x32xf32> to vector<16x32xf32>
    %78 = arith.addf %75, %77 : vector<16x32xf32>
    %cst_31 = arith.constant 0.000000e+00 : f32
    %79 = vector.broadcast %cst_31 : f32 to vector<16x32xf32>
    %80 = arith.maximumf %78, %79 : vector<16x32xf32>
    %c0_32 = arith.constant 0 : index
    %c0_33 = arith.constant 0 : index
    %81 = vector.load %arg9[%c0_32, %c0_33] : memref<32x32xf32, #tpu.memory_space<vmem>>, vector<32x32xf32>
    %cst_34 = arith.constant dense<0.000000e+00> : vector<16x32xf32>
    %82 = tpu.matmul %80, %81, %cst_34 {dimension_numbers = #tpu.dot_dimension_numbers<[1], [0], [0], [1], [0, 0, 1, 1], [], []>} : vector<16x32xf32>, vector<32x32xf32>, vector<16x32xf32> -> vector<16x32xf32>
    %c0_35 = arith.constant 0 : index
    %c0_36 = arith.constant 0 : index
    %83 = vector.load %arg10[%c0_35, %c0_36] : memref<32x4xf32, #tpu.memory_space<vmem>>, vector<32x4xf32>
    %cst_37 = arith.constant dense<0.000000e+00> : vector<16x4xf32>
    %84 = tpu.matmul %82, %83, %cst_37 {dimension_numbers = #tpu.dot_dimension_numbers<[1], [0], [0], [1], [0, 0, 1, 1], [], []>} : vector<16x32xf32>, vector<32x4xf32>, vector<16x4xf32> -> vector<16x4xf32>
    %85 = vector.extract_strided_slice %84 {offsets = [0, 2], sizes = [16, 2], strides = [1, 1]} : vector<16x4xf32> to vector<16x2xf32>
    %86 = tpu.transpose %85, [1, 0] : vector<16x2xf32> -> vector<2x16xf32>
    %87 = vector.extract_strided_slice %84 {offsets = [0, 0], sizes = [16, 1], strides = [1, 1]} : vector<16x4xf32> to vector<16x1xf32>
    %88 = vector.extract_strided_slice %86 {offsets = [0, 0], sizes = [1, 16], strides = [1, 1]} : vector<2x16xf32> to vector<1x16xf32>
    %89 = vector.broadcast %87 : vector<16x1xf32> to vector<16x16xf32>
    %90 = vector.broadcast %88 : vector<1x16xf32> to vector<16x16xf32>
    %91 = arith.addf %89, %90 : vector<16x16xf32>
    %cst_38 = arith.constant 0.000000e+00 : f32
    %92 = vector.broadcast %cst_38 : f32 to vector<16x16xf32>
    %93 = arith.cmpf ogt, %91, %92 : vector<16x16xf32>
    %cst_39 = arith.constant 2.000000e-01 : f32
    %94 = vector.broadcast %cst_39 : f32 to vector<16x16xf32>
    %95 = arith.mulf %94, %91 : vector<16x16xf32>
    %96 = arith.select %93, %91, %95 : vector<16x16xi1>, vector<16x16xf32>
    %97 = arith.addf %96, %0 : vector<16x16xf32>
    %cst_40 = arith.constant dense<0xFF800000> : vector<16xf32>
    %98 = vector.multi_reduction <maximumf>, %97, %cst_40 [1] : vector<16x16xf32> to vector<16xf32>
    %99 = vector.shape_cast %98 : vector<16xf32> to vector<16x1xf32>
    %100 = vector.broadcast %99 : vector<16x1xf32> to vector<16x16xf32>
    %101 = arith.subf %97, %100 : vector<16x16xf32>
    %102 = math.exp %101 : vector<16x16xf32>
    %cst_41 = arith.constant dense<0.000000e+00> : vector<16xf32>
    %103 = vector.multi_reduction <add>, %102, %cst_41 [1] : vector<16x16xf32> to vector<16xf32>
    %104 = vector.shape_cast %103 : vector<16xf32> to vector<16x1xf32>
    %105 = vector.extract_strided_slice %1 {offsets = [0, 0], sizes = [1, 32], strides = [1, 1]} : vector<2x32xf32> to vector<1x32xf32>
    %106 = vector.broadcast %105 : vector<1x32xf32> to vector<16x32xf32>
    %107 = arith.mulf %82, %106 : vector<16x32xf32>
    %cst_42 = arith.constant dense<0.000000e+00> : vector<16x32xf32>
    %108 = tpu.matmul %102, %107, %cst_42 {dimension_numbers = #tpu.dot_dimension_numbers<[1], [0], [0], [1], [0, 0, 1, 1], [], []>} : vector<16x16xf32>, vector<16x32xf32>, vector<16x32xf32> -> vector<16x32xf32>
    %109 = tpu.reciprocal %104 {approx = true} : vector<16x1xf32> -> vector<16x1xf32>
    %110 = arith.mulf %104, %109 : vector<16x1xf32>
    %cst_43 = arith.constant 2.000000e+00 : f32
    %111 = vector.broadcast %cst_43 : f32 to vector<16x1xf32>
    %112 = arith.subf %111, %110 : vector<16x1xf32>
    %113 = arith.mulf %109, %112 : vector<16x1xf32>
    %114 = vector.broadcast %113 : vector<16x1xf32> to vector<16x32xf32>
    %115 = arith.mulf %108, %114 : vector<16x32xf32>
    %116 = vector.extract_strided_slice %84 {offsets = [0, 1], sizes = [16, 1], strides = [1, 1]} : vector<16x4xf32> to vector<16x1xf32>
    %117 = vector.extract_strided_slice %86 {offsets = [1, 0], sizes = [1, 16], strides = [1, 1]} : vector<2x16xf32> to vector<1x16xf32>
    %118 = vector.broadcast %116 : vector<16x1xf32> to vector<16x16xf32>
    %119 = vector.broadcast %117 : vector<1x16xf32> to vector<16x16xf32>
    %120 = arith.addf %118, %119 : vector<16x16xf32>
    %cst_44 = arith.constant 0.000000e+00 : f32
    %121 = vector.broadcast %cst_44 : f32 to vector<16x16xf32>
    %122 = arith.cmpf ogt, %120, %121 : vector<16x16xf32>
    %cst_45 = arith.constant 2.000000e-01 : f32
    %123 = vector.broadcast %cst_45 : f32 to vector<16x16xf32>
    %124 = arith.mulf %123, %120 : vector<16x16xf32>
    %125 = arith.select %122, %120, %124 : vector<16x16xi1>, vector<16x16xf32>
    %126 = arith.addf %125, %0 : vector<16x16xf32>
    %cst_46 = arith.constant dense<0xFF800000> : vector<16xf32>
    %127 = vector.multi_reduction <maximumf>, %126, %cst_46 [1] : vector<16x16xf32> to vector<16xf32>
    %128 = vector.shape_cast %127 : vector<16xf32> to vector<16x1xf32>
    %129 = vector.broadcast %128 : vector<16x1xf32> to vector<16x16xf32>
    %130 = arith.subf %126, %129 : vector<16x16xf32>
    %131 = math.exp %130 : vector<16x16xf32>
    %cst_47 = arith.constant dense<0.000000e+00> : vector<16xf32>
    %132 = vector.multi_reduction <add>, %131, %cst_47 [1] : vector<16x16xf32> to vector<16xf32>
    %133 = vector.shape_cast %132 : vector<16xf32> to vector<16x1xf32>
    %134 = vector.extract_strided_slice %1 {offsets = [1, 0], sizes = [1, 32], strides = [1, 1]} : vector<2x32xf32> to vector<1x32xf32>
    %135 = vector.broadcast %134 : vector<1x32xf32> to vector<16x32xf32>
    %136 = arith.mulf %82, %135 : vector<16x32xf32>
    %cst_48 = arith.constant dense<0.000000e+00> : vector<16x32xf32>
    %137 = tpu.matmul %131, %136, %cst_48 {dimension_numbers = #tpu.dot_dimension_numbers<[1], [0], [0], [1], [0, 0, 1, 1], [], []>} : vector<16x16xf32>, vector<16x32xf32>, vector<16x32xf32> -> vector<16x32xf32>
    %138 = tpu.reciprocal %133 {approx = true} : vector<16x1xf32> -> vector<16x1xf32>
    %139 = arith.mulf %133, %138 : vector<16x1xf32>
    %cst_49 = arith.constant 2.000000e+00 : f32
    %140 = vector.broadcast %cst_49 : f32 to vector<16x1xf32>
    %141 = arith.subf %140, %139 : vector<16x1xf32>
    %142 = arith.mulf %138, %141 : vector<16x1xf32>
    %143 = vector.broadcast %142 : vector<16x1xf32> to vector<16x32xf32>
    %144 = arith.mulf %137, %143 : vector<16x32xf32>
    %145 = arith.addf %115, %144 : vector<16x32xf32>
    %c0_50 = arith.constant 0 : index
    %c0_51 = arith.constant 0 : index
    %146 = vector.load %arg11[%c0_50, %c0_51] : memref<1x32xf32, #tpu.memory_space<vmem>>, vector<1x32xf32>
    %147 = vector.broadcast %146 : vector<1x32xf32> to vector<16x32xf32>
    %148 = arith.mulf %145, %147 : vector<16x32xf32>
    %c0_52 = arith.constant 0 : index
    %c0_53 = arith.constant 0 : index
    %149 = vector.load %arg12[%c0_52, %c0_53] : memref<1x32xf32, #tpu.memory_space<vmem>>, vector<1x32xf32>
    %150 = vector.broadcast %149 : vector<1x32xf32> to vector<16x32xf32>
    %151 = arith.addf %148, %150 : vector<16x32xf32>
    %cst_54 = arith.constant 5.000000e-01 : f32
    %152 = vector.broadcast %cst_54 : f32 to vector<16x32xf32>
    %153 = arith.mulf %152, %7 : vector<16x32xf32>
    %154 = arith.addf %151, %153 : vector<16x32xf32>
    %cst_55 = arith.constant 0.000000e+00 : f32
    %155 = vector.broadcast %cst_55 : f32 to vector<16x32xf32>
    %156 = arith.maximumf %154, %155 : vector<16x32xf32>
    %157 = arith.addf %80, %156 : vector<16x32xf32>
    %c0_56 = arith.constant 0 : index
    %c0_57 = arith.constant 0 : index
    %158 = vector.load %arg13[%c0_56, %c0_57] : memref<32x6xf32, #tpu.memory_space<vmem>>, vector<32x6xf32>
    %cst_58 = arith.constant dense<0.000000e+00> : vector<16x6xf32>
    %159 = tpu.matmul %157, %158, %cst_58 {dimension_numbers = #tpu.dot_dimension_numbers<[1], [0], [0], [1], [0, 0, 1, 1], [], []>} : vector<16x32xf32>, vector<32x6xf32>, vector<16x6xf32> -> vector<16x6xf32>
    %c0_59 = arith.constant 0 : index
    %c0_60 = arith.constant 0 : index
    %160 = vector.load %arg14[%c0_59, %c0_60] : memref<1x6xf32, #tpu.memory_space<vmem>>, vector<1x6xf32>
    %161 = vector.broadcast %160 : vector<1x6xf32> to vector<16x6xf32>
    %162 = arith.addf %159, %161 : vector<16x6xf32>
    %c0_61 = arith.constant 0 : index
    %c0_62 = arith.constant 0 : index
    %163 = vector.load %arg15[%c0_61, %c0_62] : memref<16x6xf32, #tpu.memory_space<vmem>>, vector<16x6xf32>
    tpu.vector_store %arg15[%c0_61, %c0_62], %162 {strides = array<i32>} : memref<16x6xf32, #tpu.memory_space<vmem>>, vector<16x6xf32>,
    return
  }
}

</mosaic_0001>

<bundles_post_ra>
// kernel: tpu_custom_call.1
= control target key start
LH: loop header
LB: loop body
LE: loop exit
PB: predicated region body
PF: predicated region fallthrough
CT: control target
= control target key end

     0   :  { %vm63_vm0 = vcmask 64512   ;;  %vm149_vm1 = vcmask 261120   ;;  %v1517_v20 = vmov 0   ;;  %v364_v21 = vlaneseq  ;;  %s1803_s3 = inlined_call_operand.vmem [shape: f32[8,32], index: 3, kind: input, shape index: {}]   ;;  %s1804_s0 = inlined_call_operand.vmem [shape: f32[16,8], index: 0, kind: input, shape index: {}]   ;;  %s1805_s5 = inlined_call_operand.vmem [shape: f32[32,32], index: 5, kind: input, shape index: {}]   ;;  %s1806_s6 = inlined_call_operand.vmem [shape: f32[32,4], index: 6, kind: input, shape index: {}]   ;;  %s1807_s4 = inlined_call_operand.vmem [shape: f32[1,32], index: 4, kind: input, shape index: {}]   ;;  %s1808_s2 = inlined_call_operand.vmem [shape: f32[2,32], index: 2, kind: input, shape index: {}]   ;;  %s1809_s1 = inlined_call_operand.vmem [shape: f32[16,16], index: 1, kind: input, shape index: {}]   ;;  %s1810_s9 = inlined_call_operand.vmem [shape: f32[32,32], index: 9, kind: input, shape index: {}]   ;;  %s1811_s10 = inlined_call_operand.vmem [shape: f32[32,4], index: 10, kind: input, shape index: {}]   ;;  %s1812_s7 = inlined_call_operand.vmem [shape: f32[1,32], index: 7, kind: input, shape index: {}]   ;;  %s1813_s8 = inlined_call_operand.vmem [shape: f32[1,32], index: 8, kind: input, shape index: {}]   ;;  %s1814_s13 = inlined_call_operand.vmem [shape: f32[32,6], index: 13, kind: input, shape index: {}]   ;;  %s1815_s11 = inlined_call_operand.vmem [shape: f32[1,32], index: 11, kind: input, shape index: {}]   ;;  %s1816_s12 = inlined_call_operand.vmem [shape: f32[1,32], index: 12, kind: input, shape index: {}]   ;;  %s1817_s14 = inlined_call_operand.vmem [shape: f32[1,6], index: 14, kind: input, shape index: {}]   ;;  %s1818_s15 = inlined_call_operand.vmem [shape: f32[16,6], index: 15, kind: output, shape index: {}]  }
   0x1   :  { %v55_v0 = vld [vmem:[%s1803_s3] sm:$0xff]  ;;  %v54_v2 = vld [vmem:[%s1804_s0 + $0x8] sm:$0xff]  ;;  %v147_v6 = vld [vmem:[%s1805_s5 + $0x10] sm:$0xff]  ;;  %1479 = vset.pattern.permute.xlu1 %v1517_v20  ;;  %v1518_v36 = vmov 1   ;;  %vm378_vm4 = vcmask 130048   ;;  %vm1249_vm11 = vcmask 48128  }
   0x2   :  { %v53_v1 = vld [vmem:[%s1804_s0] sm:$0xff]  ;;  %1331 = vmatprep.subr.mxu0 %v55_v0  ;;  %v146_v4 = vld [vmem:[%s1805_s5 + $0x8] sm:$0xff]  ;;  %v148_v7 = vld [vmem:[%s1805_s5 + $0x18] sm:$0xff]  ;;  %v365_v22 = vshrl.u32 %v364_v21, 7  ;;  %1480 = vset.pattern.permute.xlu0 %v1518_v36 }
   0x3   :  { %1333 = vmatprep.mubr.msk.f32.mxu0 %vm63_vm0, %v53_v1  ;;  %v145_v3 = vld [vmem:[%s1805_s5] sm:$0xff]  ;;  %1332 = vmatpush3.msra.mxu0 %v55_v0  ;;  %v1423_v8 = vpack.c.bf16 %v148_v7, %v147_v6  ;;  %v232_v10 = vld [vmem:[%s1806_s6 + $0x8] sm:$0xff]  ;;  %v233_v11 = vld [vmem:[%s1806_s6 + $0x10] sm:$0xff] }
   0x4   :  { %v1419_v5 = vpack.c.bf16 %v146_v4, %v145_v3  ;;  %1334 = vmatmul.mubr.msk.f32.vlgmr.msra.gmra.mrb[0].mxu0 %vm63_vm0, %v54_v2  ;;  %v231_v9 = vld [vmem:[%s1806_s6] sm:$0xff]  ;;  %v234_v13 = vld [vmem:[%s1806_s6 + $0x18] sm:$0xff]  ;;  %v1644_v23 = vsub.s32 0, %v365_v22  ;;  %v1646_v24 = vsub.s32 1, %v365_v22  ;;  %v1680_v56 = vld [vmem:[%s1809_s1 + $0x8] sm:$0xff] }
   0x5   :  { %v1427_v12 = vpack.c.bf16 %v232_v10, %v231_v9  ;;  %v1431_v14 = vpack.c.bf16 %v234_v13, %v233_v11  ;;  %v1256_v15 = vld [vmem:[%s1807_s4] ss:$0 sm:$0xff] }
   0x6   :  { %1420 = vmatprep.subr.bf16.mxu1 %v1419_v5  ;;  %v52_v25 = vld [vmem:[%s1808_s2] sm:$0x3]  ;;  %s1519_s2 = smov 126  }
   0x7   :  { %1422 = vmatpush3.bf16.msra.mxu1 %v1419_v5  ;;  %1428 = vmatprep.subr.bf16.mxu0 %v1427_v12  ;;  %v1652_v26 = vrot.slane %v52_v25, %v1644_v23  ;;  %v1655_v27 = vrot.slane %v52_v25, %v1646_v24  ;;  %v1675_v51 = vld [vmem:[%s1809_s1] sm:$0xff] }
   0x8   :  { %1424 = vmatprep.subr.bf16.mxu1 %v1423_v8  ;;  %1430 = vmatpush3.bf16.msra.mxu0 %v1427_v12 }
   0x9   :  { %1432 = vmatprep.subr.bf16.mxu0 %v1431_v14 }
   0xb   :  { %1426 = vmatpush3.bf16.msra.mxu1 %v1423_v8 }
   0xc   :  { %1434 = vmatpush3.bf16.msra.mxu0 %v1431_v14 }
  0xd7   :  { %v1335_v16 = vpop.f32.mrb[0].mxu0 }
  0xd8   :  { %v136_v17 = vpop.f32.mrb[1].mxu0  ;;  %v1638_v19 = vadd.f32 %v1335_v16, %v1256_v15 }
  0xd9   :  { %v1636_v18 = vadd.f32 %v1256_v15, %v136_v17 }
  0xdb   :  { %1344 = vmatprep.mubr.msk.f32.mxu1 %vm149_vm1, %v1636_v18 }
  0xdc   :  { %1345 = vmatmul.mubr.msk.f32.vlgmr.msra.gmra.mrb[0].mxu1 %vm149_vm1, %v1638_v19 }
 0x1af   :  { %v1346_v28 = vpop.f32.mrb[0].mxu1 }
 0x1b0   :  { %v402_v29 = vmul.f32 %v1346_v28, %v1652_v26  ;;  %v539_v30 = vmul.f32 %v1346_v28, %v1655_v27  ;;  %v222_v31 = vpop.f32.mrb[1].mxu1 }
 0x1b1   :  { %v401_v32 = vmul.f32 %v1652_v26, %v222_v31  ;;  %v538_v33 = vmul.f32 %v1655_v27, %v222_v31  ;;  %1355 = vmatprep.mubr.msk.f32.mxu0 %vm149_vm1, %v222_v31 }
 0x1b2   :  { %1356 = vmatmul.mubr.msk.f32.vlgmr.msra.gmra.mrb[2].mxu0 %vm149_vm1, %v1346_v28 }
 0x1b3   :  { %v1435_v34 = vpack.c.bf16 %v402_v29, %v401_v32  ;;  %v1663_v35 = vpack.c.bf16 %v539_v30, %v538_v33  ;;  %v653_v32 = vld [vmem:[%s1810_s9] sm:$0xff]  ;;  %v654_v33 = vld [vmem:[%s1810_s9 + $0x8] sm:$0xff] }
 0x1b5   :  { %1436 = vmatprep.subr.bf16.mxu0 %v1435_v34 }
 0x1b6   :  { %1438 = vmatpush3.bf16.msra.mxu0 %v1435_v34  ;;  %v1443_v34 = vpack.c.bf16 %v654_v33, %v653_v32 }
 0x1b7   :  { %1440 = vmatprep.subr.bf16.mxu0 %v1663_v35 }
 0x1b8   :  { %1444 = vmatprep.subr.bf16.mxu1 %v1443_v34 }
 0x1b9   :  { %1446 = vmatpush3.bf16.msra.mxu1 %v1443_v34 }
 0x285   :  { %v1357_v37 = vpop.f32.mrb[2].mxu0 }
 0x286   :  { %361 = vperm.xlu1 %1479, %v1357_v37   ;;  %v307_v38 = vpop.f32.mrb[3].mxu0 }
 0x287   :  { %318 = vrot.lane.b32.xlu0 %v307_v38, %s1519_s2 }
 0x28a   :  { %357 = vperm.xlu1 %1479, %v307_v38  }
 0x28b   :  { %320 = vrot.lane.b32.xlu0 %v1357_v37, %s1519_s2 }
 0x28e   :  { %1481 = vset.pattern.permute.xlu1 %v1518_v36 }
 0x28f   :  { %499 = vperm.xlu1 %1481, %v1357_v37   ;;  %495 = vperm.xlu0 %1480, %v307_v38   ;;  %v656_v37 = vld [vmem:[%s1810_s9 + $0x18] sm:$0xff] }
 0x293   :  { %1482 = vset.pattern.permute.xlu0 %v1517_v20 }
 0x2f9   :  { %v319_v39 = vpop.permute.xlu0 %318 }
 0x2fa   :  { %324 = vxpose.xlu1.b32.start [1/2] (short) (narrow) %v319_v39, 8  ;;  %v738_v39 = vld [vmem:[%s1811_s10] sm:$0xff] }
 0x2fd   :  { %v321_v40 = vpop.permute.xlu0 %320 }
 0x2fe   :  { %325 = vxpose.xlu1.b32.end [2/2] (short) (narrow) %v321_v40, 8  ;;  %v739_v40 = vld [vmem:[%s1811_s10 + $0x8] sm:$0xff] }
 0x305   :  { %v362_v41 = vpop.permute.xlu1 %361 }
 0x309   :  { %v358_v42 = vpop.permute.xlu1 %357 }
 0x30e   :  { %v500_v43 = vpop.permute.xlu1 %499  ;;  %v496_v47 = vpop.permute.xlu0 %495 }
 0x31c   :  { %1483 = vset.pattern.permute.xlu1 %v1517_v20 }
 0x37a   :  { %v340_v44 = vpop.trf.xlu1 }
 0x37b   :  { %v367_v45 = vrot.slane %v340_v44, %v1644_v23  ;;  %v505_v46 = vrot.slane %v340_v44, %v1646_v24 }
 0x37d   :  { %v368_v48 = vadd.f32 %v367_v45, %v358_v42  ;;  %v369_v49 = vadd.f32 %v367_v45, %v362_v41  ;;  %v506_v50 = vadd.f32 %v505_v46, %v496_v47  ;;  %v507_v54 = vadd.f32 %v505_v46, %v500_v43  ;;  %v740_v41 = vld [vmem:[%s1811_s10 + $0x10] sm:$0xff]  ;;  %v741_v43 = vld [vmem:[%s1811_s10 + $0x18] sm:$0xff] }
 0x37e   :  { %v1451_v42 = vpack.c.bf16 %v739_v40, %v738_v39  ;;  %v1455_v44 = vpack.c.bf16 %v741_v43, %v740_v41 }
 0x37f   :  { %vm370_vm2 = vcmp.gt.f32.partialorder %v368_v48, 0.0  ;;  %v372_v52 = vmul.f32 0.2, %v368_v48  ;;  %vm371_vm3 = vcmp.gt.f32.partialorder %v369_v49, 0.0  ;;  %v373_v53 = vmul.f32 0.2, %v369_v49 }
 0x380   :  { %v510_v58 = vmul.f32 0.2, %v506_v50  ;;  %vm508_vm5 = vcmp.gt.f32.partialorder %v506_v50, 0.0  ;;  %v511_v63 = vmul.f32 0.2, %v507_v54  ;;  %vm509_vm6 = vcmp.gt.f32.partialorder %v507_v54, 0.0 }
 0x381   :  { %v374_v55 = vsel %vm370_vm2, %v368_v48, %v372_v52  ;;  %v375_v57 = vsel %vm371_vm3, %v369_v49, %v373_v53 }
 0x382   :  { %v376_v59 = vadd.f32 %v374_v55, %v1675_v51  ;;  %v377_v61 = vadd.f32 %v375_v57, %v1680_v56  ;;  %v512_v62 = vsel %vm508_vm5, %v506_v50, %v510_v58  ;;  %v513_v2 = vsel %vm509_vm6, %v507_v54, %v511_v63 }
 0x383   :  { %v514_v1 = vadd.f32 %v512_v62, %v1675_v51  ;;  %v515_v4 = vadd.f32 %v513_v2, %v1680_v56 }
 0x384   :  { %v379_v60 = vsel %vm378_vm4, %v376_v59, -inf  ;;  %v382_v0 = vsel %vm378_vm4, %v377_v61, -inf }
 0x385   :  { %380 = vmax.xlane.f32.xlu0 %v379_v60  ;;  %v516_v3 = vsel %vm378_vm4, %v514_v1, -inf  ;;  %v519_v5 = vsel %vm378_vm4, %v515_v4, -inf }
 0x389   :  { %383 = vmax.xlane.f32.xlu0 %v382_v0 }
 0x38d   :  { %517 = vmax.xlane.f32.xlu0 %v516_v3 }
 0x391   :  { %520 = vmax.xlane.f32.xlu0 %v519_v5 }
 0x412   :  { %v381_v6 = vpop.xlane.xlu0 %380 }
 0x413   :  { %v385_v7 = vsub.f32 %v376_v59, %v381_v6 }
 0x415   :  { %v387_v8 = vmul.f32 1.442695, %v385_v7 }
 0x416   :  { %v384_v9 = vpop.xlane.xlu0 %383 }
 0x417   :  { %1485 = vpow2.f32 %v387_v8  ;;  %v386_v10 = vsub.f32 %v377_v61, %v384_v9 }
 0x419   :  { %v389_v11 = vmul.f32 1.442695, %v386_v10  ;;  %v1267_v10 = vld [vmem:[%s1812_s7] ss:$0 sm:$0xff] }
 0x41a   :  { %v518_v12 = vpop.xlane.xlu0 %517 }
 0x41b   :  { %1487 = vpow2.f32 %v389_v11  ;;  %v522_v13 = vsub.f32 %v514_v1, %v518_v12 }
 0x41d   :  { %v524_v14 = vmul.f32 1.442695, %v522_v13  ;;  %v1268_v13 = vld [vmem:[%s1813_s8] ss:$0 sm:$0xff] }
 0x41e   :  { %v521_v15 = vpop.xlane.xlu0 %520 }
 0x41f   :  { %1489 = vpow2.f32 %v524_v14  ;;  %v523_v16 = vsub.f32 %v515_v4, %v521_v15 }
 0x421   :  { %v1486_v17 = vpop.eup %1485  ;;  %v526_v20 = vmul.f32 1.442695, %v523_v16 }
 0x422   :  { %1362 = vmatprep.mubr.msk.f32.mxu0 %vm378_vm4, %v1486_v17  ;;  %v391_v21 = vsel %vm378_vm4, %v1486_v17, 0.0 }
 0x423   :  { %1491 = vpow2.f32 %v526_v20  ;;  %392 = vadd.xlane.f32.xlu1 %v391_v21 }
 0x425   :  { %v1488_v22 = vpop.eup %1487 }
 0x426   :  { %1363 = vmatmul.mubr.msk.f32.vlgmr.msra.gmra.mrb[4].mxu0 %vm378_vm4, %v1488_v22  ;;  %v394_v30 = vsel %vm378_vm4, %v1488_v22, 0.0 }
 0x427   :  { %1442 = vmatpush3.bf16.msra.mxu0 %v1663_v35  ;;  %v655_v35 = vld [vmem:[%s1810_s9 + $0x10] sm:$0xff] }
 0x428   :  { %v1447_v38 = vpack.c.bf16 %v656_v37, %v655_v35  ;;  %1452 = vmatprep.subr.bf16.mxu0 %v1451_v42 }
 0x429   :  { %v1490_v25 = vpop.eup %1489 }
 0x42a   :  { %1369 = vmatprep.mubr.msk.f32.mxu0 %vm378_vm4, %v1490_v25  ;;  %v528_v28 = vsel %vm378_vm4, %v1490_v25, 0.0  ;;  %1448 = vmatprep.subr.bf16.mxu1 %v1447_v38 }
 0x42b   :  { %529 = vadd.xlane.f32.xlu0 %v528_v28  ;;  %1450 = vmatpush3.bf16.msra.mxu1 %v1447_v38 }
 0x42d   :  { %v1492_v29 = vpop.eup %1491 }
 0x42e   :  { %1370 = vmatmul.mubr.msk.f32.vlgmr.msra.gmra.mrb[6].mxu0 %vm378_vm4, %v1492_v29  ;;  %v531_v31 = vsel %vm378_vm4, %v1492_v29, 0.0 }
 0x42f   :  { %395 = vadd.xlane.f32.xlu0 %v394_v30  ;;  %1454 = vmatpush3.bf16.msra.mxu0 %v1451_v42 }
 0x430   :  { %1456 = vmatprep.subr.bf16.mxu0 %v1455_v44 }
 0x433   :  { %532 = vadd.xlane.f32.xlu0 %v531_v31  ;;  %1458 = vmatpush3.bf16.msra.mxu0 %v1455_v44 }
 0x4b0   :  { %v393_v47 = vpop.xlane.xlu1 %392 }
 0x4b1   :  { %1493 = vrcp.f32 %v393_v47 }
 0x4b8   :  { %v530_v45 = vpop.xlane.xlu0 %529 }
 0x4bb   :  { %v1494_v49 = vpop.eup %1493 }
 0x4bc   :  { %v396_v46 = vpop.xlane.xlu0 %395  ;;  %v486_v57 = vmul.f32 %v1494_v49, %v393_v47 }
 0x4bd   :  { %1495 = vrcp.f32 %v396_v46 }
 0x4be   :  { %v488_v63 = vsub.f32 2.0, %v486_v57 }
 0x4c0   :  { %v533_v48 = vpop.xlane.xlu0 %532  ;;  %v490_v3 = vmul.f32 %v1494_v49, %v488_v63 }
 0x4c1   :  { %1497 = vrcp.f32 %v533_v48 }
 0x4c2   :  { %1499 = vrcp.f32 %v530_v45 }
 0x4c7   :  { %v1496_v50 = vpop.eup %1495 }
 0x4c8   :  { %v487_v54 = vmul.f32 %v1496_v50, %v396_v46 }
 0x4ca   :  { %v489_v61 = vsub.f32 2.0, %v487_v54 }
 0x4cb   :  { %v1498_v52 = vpop.eup %1497 }
 0x4cc   :  { %v1500_v53 = vpop.eup %1499  ;;  %v624_v55 = vmul.f32 %v1498_v52, %v533_v48  ;;  %v491_v1 = vmul.f32 %v1496_v50, %v489_v61 }
 0x4cd   :  { %v623_v58 = vmul.f32 %v1500_v53, %v530_v45 }
 0x4ce   :  { %v626_v62 = vsub.f32 2.0, %v624_v55 }
 0x4cf   :  { %v625_v0 = vsub.f32 2.0, %v623_v58 }
 0x4d0   :  { %v628_v2 = vmul.f32 %v1498_v52, %v626_v62 }
 0x4d1   :  { %v627_v5 = vmul.f32 %v1500_v53, %v625_v0 }
 0x4f9   :  { %v1364_v59 = vpop.f32.mrb[4].mxu0 }
 0x4fa   :  { %v475_v60 = vpop.f32.mrb[5].mxu0  ;;  %v493_v6 = vmul.f32 %v1364_v59, %v491_v1 }
 0x4fb   :  { %v492_v9 = vmul.f32 %v490_v3, %v475_v60 }
 0x501   :  { %v1371_v4 = vpop.f32.mrb[6].mxu0 }
 0x502   :  { %v630_v7 = vmul.f32 %v1371_v4, %v628_v2  ;;  %v612_v8 = vpop.f32.mrb[7].mxu0 }
 0x503   :  { %v629_v11 = vmul.f32 %v627_v5, %v612_v8 }
 0x504   :  { %v632_v12 = vadd.f32 %v630_v7, %v493_v6 }
 0x505   :  { %v631_v14 = vadd.f32 %v629_v11, %v492_v9 }
 0x506   :  { %v641_v15 = vmul.f32 %v1267_v10, %v632_v12 }
 0x507   :  { %v640_v16 = vmul.f32 %v1267_v10, %v631_v14 }
 0x508   :  { %v1729_v17 = vadd.f32 %v1268_v13, %v641_v15 }
 0x509   :  { %v1731_v20 = vadd.f32 %v1268_v13, %v640_v16 }
 0x50a   :  { %v652_v22 = vmax.f32 %v1729_v17, 0.0 }
 0x50b   :  { %v651_v21 = vmax.f32 %v1731_v20, 0.0 }
 0x50d   :  { %1380 = vmatprep.mubr.msk.f32.mxu1 %vm149_vm1, %v651_v21 }
 0x50e   :  { %1381 = vmatmul.mubr.msk.f32.vlgmr.msra.gmra.mrb[2].mxu1 %vm149_vm1, %v652_v22 }
 0x5e1   :  { %v1382_v25 = vpop.f32.mrb[2].mxu1 }
 0x5e2   :  { %v904_v28 = vmul.f32 %v1382_v25, %v1652_v26  ;;  %v1037_v29 = vmul.f32 %v1382_v25, %v1655_v27  ;;  %v729_v30 = vpop.f32.mrb[3].mxu1 }
 0x5e3   :  { %v903_v31 = vmul.f32 %v729_v30, %v1652_v26  ;;  %v1036_v32 = vmul.f32 %v729_v30, %v1655_v27  ;;  %1391 = vmatprep.mubr.msk.f32.mxu0 %vm149_vm1, %v729_v30 }
 0x5e4   :  { %1392 = vmatmul.mubr.msk.f32.vlgmr.msra.gmra.mrb[8].mxu0 %vm149_vm1, %v1382_v25 }
 0x5e5   :  { %v1459_v33 = vpack.c.bf16 %v904_v28, %v903_v31  ;;  %v1463_v34 = vpack.c.bf16 %v1037_v29, %v1036_v32  ;;  %v1157_v28 = vld [vmem:[%s1814_s13] sm:$0xff]  ;;  %v1158_v29 = vld [vmem:[%s1814_s13 + $0x8] sm:$0xff]  ;;  %v1159_v31 = vld [vmem:[%s1814_s13 + $0x10] sm:$0xff] }
 0x5e6   :  { %v1467_v30 = vpack.c.bf16 %v1158_v29, %v1157_v28  ;;  %v1160_v32 = vld [vmem:[%s1814_s13 + $0x18] sm:$0xff] }
 0x5e7   :  { %1460 = vmatprep.subr.bf16.mxu1 %v1459_v33  ;;  %1464 = vmatprep.subr.bf16.mxu0 %v1463_v34 }
 0x5e8   :  { %1462 = vmatpush3.bf16.msra.mxu1 %v1459_v33  ;;  %1466 = vmatpush3.bf16.msra.mxu0 %v1463_v34  ;;  %v1471_v33 = vpack.c.bf16 %v1160_v32, %v1159_v31 }
 0x5e9   :  { %1468 = vmatprep.subr.bf16.mxu1 %v1467_v30 }
 0x6b7   :  { %v1393_v35 = vpop.f32.mrb[8].mxu0 }
 0x6b8   :  { %v814_v37 = vpop.f32.mrb[9].mxu0 }
 0x6b9   :  { %864 = vperm.xlu1 %1483, %v814_v37   ;;  %825 = vrot.lane.b32.xlu0 %v814_v37, %s1519_s2 }
 0x6bd   :  { %827 = vrot.lane.b32.xlu0 %v1393_v35, %s1519_s2 }
 0x6c1   :  { %868 = vperm.xlu0 %1482, %v1393_v35  }
 0x6c5   :  { %1484 = vset.pattern.permute.xlu0 %v1518_v36 }
 0x6c6   :  { %997 = vperm.xlu0 %1484, %v814_v37  }
 0x6ca   :  { %1001 = vperm.xlu0 %1484, %v1393_v35  }
 0x72b   :  { %v826_v26 = vpop.permute.xlu0 %825 }
 0x72c   :  { %831 = vxpose.xlu1.b32.start [1/2] (short) (narrow) %v826_v26, 8 }
 0x72f   :  { %v828_v27 = vpop.permute.xlu0 %827 }
 0x730   :  { %832 = vxpose.xlu1.b32.end [2/2] (short) (narrow) %v828_v27, 8 }
 0x738   :  { %v865_v39 = vpop.permute.xlu1 %864 }
 0x740   :  { %v869_v38 = vpop.permute.xlu0 %868 }
 0x745   :  { %v998_v40 = vpop.permute.xlu0 %997 }
 0x749   :  { %v1002_v48 = vpop.permute.xlu0 %1001 }
 0x7ac   :  { %v847_v41 = vpop.trf.xlu1 }
 0x7ad   :  { %v874_v42 = vrot.slane %v847_v41, %v1644_v23  ;;  %v1007_v43 = vrot.slane %v847_v41, %v1646_v24 }
 0x7af   :  { %v875_v44 = vadd.f32 %v874_v42, %v865_v39  ;;  %v876_v45 = vadd.f32 %v874_v42, %v869_v38  ;;  %v1008_v46 = vadd.f32 %v1007_v43, %v998_v40  ;;  %v1009_v49 = vadd.f32 %v1007_v43, %v1002_v48 }
 0x7b1   :  { %vm877_vm7 = vcmp.gt.f32.partialorder %v875_v44, 0.0  ;;  %v879_v47 = vmul.f32 0.2, %v875_v44  ;;  %vm1010_vm8 = vcmp.gt.f32.partialorder %v1008_v46, 0.0  ;;  %v1012_v36 = vmul.f32 0.2, %v1008_v46 }
 0x7b2   :  { %v880_v53 = vmul.f32 0.2, %v876_v45  ;;  %vm878_vm9 = vcmp.gt.f32.partialorder %v876_v45, 0.0  ;;  %v1013_v57 = vmul.f32 0.2, %v1009_v49  ;;  %vm1011_vm10 = vcmp.gt.f32.partialorder %v1009_v49, 0.0 }
 0x7b3   :  { %v881_v50 = vsel %vm877_vm7, %v875_v44, %v879_v47  ;;  %v1014_v52 = vsel %vm1010_vm8, %v1008_v46, %v1012_v36 }
 0x7b4   :  { %v883_v54 = vadd.f32 %v881_v50, %v1675_v51  ;;  %v1016_v23 = vadd.f32 %v1014_v52, %v1675_v51  ;;  %v882_v24 = vsel %vm878_vm9, %v876_v45, %v880_v53  ;;  %v1015_v60 = vsel %vm1011_vm10, %v1009_v49, %v1013_v57 }
 0x7b5   :  { %v884_v59 = vadd.f32 %v882_v24, %v1680_v56  ;;  %v1017_v62 = vadd.f32 %v1015_v60, %v1680_v56 }
 0x7b6   :  { %v885_v55 = vsel %vm378_vm4, %v883_v54, -inf  ;;  %v1018_v58 = vsel %vm378_vm4, %v1016_v23, -inf }
 0x7b7   :  { %886 = vmax.xlane.f32.xlu0 %v885_v55  ;;  %v888_v61 = vsel %vm378_vm4, %v884_v59, -inf  ;;  %v1021_v63 = vsel %vm378_vm4, %v1017_v62, -inf }
 0x7bb   :  { %1019 = vmax.xlane.f32.xlu0 %v1018_v58 }
 0x7bf   :  { %889 = vmax.xlane.f32.xlu0 %v888_v61 }
 0x7c3   :  { %1022 = vmax.xlane.f32.xlu0 %v1021_v63 }
 0x844   :  { %v887_v0 = vpop.xlane.xlu0 %886 }
 0x845   :  { %v891_v51 = vsub.f32 %v883_v54, %v887_v0 }
 0x847   :  { %v893_v1 = vmul.f32 1.442695, %v891_v51 }
 0x848   :  { %v1020_v2 = vpop.xlane.xlu0 %1019 }
 0x849   :  { %1501 = vpow2.f32 %v893_v1  ;;  %v1024_v3 = vsub.f32 %v1016_v23, %v1020_v2  ;;  %v1150_v1 = vmul.f32 0.5, %v1638_v19  ;;  %v1279_v19 = vld [vmem:[%s1817_s14] ss:$0 sm:$0xff] }
 0x84b   :  { %v1026_v4 = vmul.f32 1.442695, %v1024_v3  ;;  %v1149_v3 = vmul.f32 0.5, %v1636_v18 }
 0x84c   :  { %v890_v5 = vpop.xlane.xlu0 %889 }
 0x84d   :  { %1503 = vpow2.f32 %v1026_v4  ;;  %v892_v6 = vsub.f32 %v884_v59, %v890_v5  ;;  %v1277_v59 = vld [vmem:[%s1815_s11] ss:$0 sm:$0xff] }
 0x84f   :  { %v895_v7 = vmul.f32 1.442695, %v892_v6 }
 0x850   :  { %v1023_v8 = vpop.xlane.xlu0 %1022 }
 0x851   :  { %1505 = vpow2.f32 %v895_v7  ;;  %v1025_v9 = vsub.f32 %v1017_v62, %v1023_v8  ;;  %v1278_v62 = vld [vmem:[%s1816_s12] ss:$0 sm:$0xff] }
 0x853   :  { %v1502_v10 = vpop.eup %1501  ;;  %v1028_v56 = vmul.f32 1.442695, %v1025_v9 }
 0x854   :  { %1398 = vmatprep.mubr.msk.f32.mxu1 %vm378_vm4, %v1502_v10  ;;  %v897_v11 = vsel %vm378_vm4, %v1502_v10, 0.0 }
 0x855   :  { %1507 = vpow2.f32 %v1028_v56  ;;  %898 = vadd.xlane.f32.xlu1 %v897_v11 }
 0x857   :  { %v1504_v12 = vpop.eup %1503 }
 0x858   :  { %1405 = vmatprep.mubr.msk.f32.mxu0 %vm378_vm4, %v1504_v12  ;;  %v1030_v13 = vsel %vm378_vm4, %v1504_v12, 0.0 }
 0x859   :  { %1031 = vadd.xlane.f32.xlu0 %v1030_v13 }
 0x85b   :  { %v1506_v14 = vpop.eup %1505 }
 0x85c   :  { %1399 = vmatmul.mubr.msk.f32.vlgmr.msra.gmra.mrb[4].mxu1 %vm378_vm4, %v1506_v14  ;;  %v900_v15 = vsel %vm378_vm4, %v1506_v14, 0.0 }
 0x85d   :  { %901 = vadd.xlane.f32.xlu0 %v900_v15  ;;  %1470 = vmatpush3.bf16.msra.mxu1 %v1467_v30 }
 0x85e   :  { %1472 = vmatprep.subr.bf16.mxu1 %v1471_v33 }
 0x85f   :  { %v1508_v16 = vpop.eup %1507 }
 0x860   :  { %1406 = vmatmul.mubr.msk.f32.vlgmr.msra.gmra.mrb[10].mxu0 %vm378_vm4, %v1508_v16  ;;  %v1033_v25 = vsel %vm378_vm4, %v1508_v16, 0.0 }
 0x861   :  { %1034 = vadd.xlane.f32.xlu0 %v1033_v25  ;;  %1474 = vmatpush3.bf16.msra.mxu1 %v1471_v33 }
 0x8e2   :  { %v899_v37 = vpop.xlane.xlu1 %898 }
 0x8e3   :  { %1509 = vrcp.f32 %v899_v37 }
 0x8e6   :  { %v1032_v34 = vpop.xlane.xlu0 %1031 }
 0x8ea   :  { %v902_v35 = vpop.xlane.xlu0 %901 }
 0x8eb   :  { %1511 = vrcp.f32 %v902_v35 }
 0x8ed   :  { %v1510_v27 = vpop.eup %1509 }
 0x8ee   :  { %v1035_v26 = vpop.xlane.xlu0 %1034  ;;  %v988_v43 = vmul.f32 %v1510_v27, %v899_v37 }
 0x8ef   :  { %1513 = vrcp.f32 %v1035_v26 }
 0x8f0   :  { %1515 = vrcp.f32 %v1032_v34  ;;  %v990_v47 = vsub.f32 2.0, %v988_v43 }
 0x8f2   :  { %v992_v53 = vmul.f32 %v1510_v27, %v990_v47 }
 0x8f5   :  { %v1512_v38 = vpop.eup %1511 }
 0x8f6   :  { %v989_v41 = vmul.f32 %v1512_v38, %v902_v35 }
 0x8f8   :  { %v991_v45 = vsub.f32 2.0, %v989_v41 }
 0x8f9   :  { %v1514_v39 = vpop.eup %1513 }
 0x8fa   :  { %v1516_v40 = vpop.eup %1515  ;;  %v1122_v42 = vmul.f32 %v1514_v39, %v1035_v26  ;;  %v993_v50 = vmul.f32 %v1512_v38, %v991_v45 }
 0x8fb   :  { %v1121_v44 = vmul.f32 %v1516_v40, %v1032_v34 }
 0x8fc   :  { %v1124_v46 = vsub.f32 2.0, %v1122_v42 }
 0x8fd   :  { %v1123_v36 = vsub.f32 2.0, %v1121_v44 }
 0x8fe   :  { %v1126_v52 = vmul.f32 %v1514_v39, %v1124_v46 }
 0x8ff   :  { %v1125_v55 = vmul.f32 %v1516_v40, %v1123_v36 }
 0x92f   :  { %v1400_v48 = vpop.f32.mrb[4].mxu1 }
 0x930   :  { %v977_v49 = vpop.f32.mrb[5].mxu1  ;;  %v995_v23 = vmul.f32 %v1400_v48, %v993_v50 }
 0x931   :  { %v994_v58 = vmul.f32 %v992_v53, %v977_v49 }
 0x933   :  { %v1407_v54 = vpop.f32.mrb[10].mxu0 }
 0x934   :  { %v1128_v24 = vmul.f32 %v1407_v54, %v1126_v52  ;;  %v1110_v57 = vpop.f32.mrb[11].mxu0 }
 0x935   :  { %v1127_v60 = vmul.f32 %v1125_v55, %v1110_v57 }
 0x936   :  { %v1130_v61 = vadd.f32 %v1128_v24, %v995_v23 }
 0x937   :  { %v1129_v63 = vadd.f32 %v1127_v60, %v994_v58 }
 0x938   :  { %v1139_v0 = vmul.f32 %v1277_v59, %v1130_v61 }
 0x939   :  { %v1138_v51 = vmul.f32 %v1277_v59, %v1129_v63 }
 0x93a   :  { %v1148_v2 = vadd.f32 %v1278_v62, %v1139_v0 }
 0x93b   :  { %v1147_v4 = vadd.f32 %v1278_v62, %v1138_v51 }
 0x93c   :  { %v1152_v5 = vadd.f32 %v1150_v1, %v1148_v2 }
 0x93d   :  { %v1151_v6 = vadd.f32 %v1149_v3, %v1147_v4 }
 0x93e   :  { %v1154_v7 = vmax.f32 %v1152_v5, 0.0 }
 0x93f   :  { %v1153_v8 = vmax.f32 %v1151_v6, 0.0 }
 0x940   :  { %v1156_v10 = vadd.f32 %v1154_v7, %v652_v22 }
 0x941   :  { %v1155_v9 = vadd.f32 %v1153_v8, %v651_v21 }
 0x943   :  { %1416 = vmatprep.mubr.msk.f32.mxu1 %vm149_vm1, %v1155_v9 }
 0x944   :  { %1417 = vmatmul.mubr.msk.f32.vlgmr.msra.gmra.mrb[6].mxu1 %vm149_vm1, %v1156_v10 }
 0xa17   :  { %v1418_v18 = vpop.f32.mrb[6].mxu1 }
 0xa18   :  { %v1246_v56 = vadd.f32 %v1418_v18, %v1279_v19  ;;  %v1240_v11 = vpop.f32.mrb[7].mxu1 }
 0xa19   :  { %v1241_v12 = vadd.f32 %v1279_v19, %v1240_v11 }
 0xa1a   :  { %1251 = vst.msk [vmem:[%s1818_s15 + $0x8] sm:$0xff] %vm1249_vm11, %v1246_v56 }
 0xa1b   :  { %1250 = vst.msk [vmem:[%s1818_s15] sm:$0xff] %vm1249_vm11, %v1241_v12 }

</bundles_post_ra>
